<compile_context>
chip_gen: v7x
topology: tpu7x:2x2x1
jax: 0.10.0
libtpu: 0.0.40
codegen_flags: <defaults>
</compile_context>

<pallas_src>
import jax
import jax.numpy as jnp
from jax.experimental import pallas as pl
from jax.experimental.pallas import tpu as pltpu


def _kfold_mean_linear_kernel(x_ref, w_ref, b_ref, o_ref):
    # Fused ensemble mean of K linear base learners:
    #   y = x @ mean_k(W_k) + mean_k(b_k)
    # K-reduce is a tiny VPU add over the leading axis; dot runs on the MXU
    # with f32 accumulation; bias add and downcast happen in the epilogue.
    w_mean = jnp.mean(w_ref[...].astype(jnp.float32), axis=0)                 # [H, O]
    b_mean = jnp.mean(b_ref[...].astype(jnp.float32), axis=0, keepdims=True)  # [1, O]
    y = jnp.dot(x_ref[...], w_mean, preferred_element_type=jnp.float32)       # [B, O]
    o_ref[...] = (y + b_mean).astype(o_ref.dtype)


@jax.jit
def kfold_bagging_forward(x, weights, biases):
    """x: [B, H], weights: [K, H, O], biases: [K, O] -> [B, O].

    Equivalent to mean_k(x @ weights[k] + biases[k]), i.e. the ensemble mean of
    the K linear base learners (exact by linearity).
    """
    B, H = x.shape
    K, H2, O = weights.shape
    assert H == H2 and biases.shape == (K, O)

    bytes_accessed = (
        x.size * x.dtype.itemsize
        + weights.size * weights.dtype.itemsize
        + biases.size * biases.dtype.itemsize
        + B * O * x.dtype.itemsize
    )
    cost = pl.CostEstimate(
        flops=2 * B * H * O + K * H * O + K * O,  # dot + K-mean reduces
        transcendentals=0,
        bytes_accessed=bytes_accessed,
    )

    return pl.pallas_call(
        _kfold_mean_linear_kernel,
        out_shape=jax.ShapeDtypeStruct((B, O), x.dtype),
        in_specs=[
            pl.BlockSpec(memory_space=pltpu.MemorySpace.VMEM),  # x       [B, H]
            pl.BlockSpec(memory_space=pltpu.MemorySpace.VMEM),  # weights [K, H, O]
            pl.BlockSpec(memory_space=pltpu.MemorySpace.VMEM),  # biases  [K, O]
        ],
        out_specs=pl.BlockSpec(memory_space=pltpu.MemorySpace.VMEM),
        cost_estimate=cost,
    )(x, weights, biases)


if __name__ == "__main__":
    # Small shapes consistent with the module: K=4 base learners,
    # batch=8, in_features=32, out_features=16.
    K, B, H, O = 4, 8, 32, 16

    key = jax.random.PRNGKey(0)
    kx, kw, kb = jax.random.split(key, 3)

    x = jax.random.normal(kx, (B, H), dtype=jnp.float32)
    # Deterministic synthetic parameters (no checkpoint load).
    weights = jax.random.normal(kw, (K, H, O), dtype=jnp.float32) * 0.1
    biases = jax.random.normal(kb, (K, O), dtype=jnp.float32) * 0.1

    out = kfold_bagging_forward(x, weights, biases)
    out = jax.block_until_ready(out)

    # Pure-JAX reference of the PyTorch semantics: stack per-model outputs, mean.
    ref = jnp.mean(
        jnp.stack([x @ weights[k] + biases[k] for k in range(K)], axis=2), axis=2
    )
    assert out.shape == (B, O)
    assert jnp.allclose(out, ref, atol=1e-5, rtol=1e-5)

    print("KERNEL_OK")
</pallas_src>

<mosaic_0001>
module attributes {stable_mosaic.version = 11 : i64} {
  func.func @_kfold_mean_linear_kernel(%arg0: memref<8x32xf32, #tpu.memory_space<vmem>>, %arg1: memref<4x32x16xf32, #tpu.memory_space<vmem>>, %arg2: memref<4x16xf32, #tpu.memory_space<vmem>>, %arg3: memref<8x16xf32, #tpu.memory_space<vmem>>) attributes {dimension_semantics = [], scalar_prefetch = 0 : i64, scratch_operands = 0 : i64, tpu.core_type = #tpu.core_type<tc>} {
    %c0 = arith.constant 0 : index
    %c0_0 = arith.constant 0 : index
    %c0_1 = arith.constant 0 : index
    %0 = vector.load %arg1[%c0, %c0_0, %c0_1] : memref<4x32x16xf32, #tpu.memory_space<vmem>>, vector<4x32x16xf32>
    %cst = arith.constant dense<0.000000e+00> : vector<32x16xf32>
    %1 = vector.multi_reduction <add>, %0, %cst [0] : vector<4x32x16xf32> to vector<32x16xf32>
    %cst_2 = arith.constant 4.000000e+00 : f32
    %2 = vector.broadcast %cst_2 : f32 to vector<32x16xf32>
    %3 = arith.divf %1, %2 : vector<32x16xf32>
    %c0_3 = arith.constant 0 : index
    %c0_4 = arith.constant 0 : index
    %4 = vector.load %arg2[%c0_3, %c0_4] : memref<4x16xf32, #tpu.memory_space<vmem>>, vector<4x16xf32>
    %cst_5 = arith.constant dense<0.000000e+00> : vector<16xf32>
    %5 = vector.multi_reduction <add>, %4, %cst_5 [0] : vector<4x16xf32> to vector<16xf32>
    %6 = vector.shape_cast %5 : vector<16xf32> to vector<1x16xf32>
    %cst_6 = arith.constant 4.000000e+00 : f32
    %7 = vector.broadcast %cst_6 : f32 to vector<1x16xf32>
    %8 = arith.divf %6, %7 : vector<1x16xf32>
    %c0_7 = arith.constant 0 : index
    %c0_8 = arith.constant 0 : index
    %9 = vector.load %arg0[%c0_7, %c0_8] : memref<8x32xf32, #tpu.memory_space<vmem>>, vector<8x32xf32>
    %cst_9 = arith.constant dense<0.000000e+00> : vector<8x16xf32>
    %10 = tpu.matmul %9, %3, %cst_9 {dimension_numbers = #tpu.dot_dimension_numbers<[1], [0], [0], [1], [0, 0, 1, 1], [], []>} : vector<8x32xf32>, vector<32x16xf32>, vector<8x16xf32> -> vector<8x16xf32>
    %11 = vector.broadcast %8 : vector<1x16xf32> to vector<8x16xf32>
    %12 = arith.addf %10, %11 : vector<8x16xf32>
    %c0_10 = arith.constant 0 : index
    %c0_11 = arith.constant 0 : index
    %13 = vector.load %arg3[%c0_10, %c0_11] : memref<8x16xf32, #tpu.memory_space<vmem>>, vector<8x16xf32>
    tpu.vector_store %arg3[%c0_10, %c0_11], %12 {strides = array<i32>} : memref<8x16xf32, #tpu.memory_space<vmem>>, vector<8x16xf32>,
    return
  }
}

</mosaic_0001>

<bundles_post_ra>
// kernel: kfold_bagging_forward.1
= control target key start
LH: loop header
LB: loop body
LE: loop exit
PB: predicated region body
PF: predicated region fallthrough
CT: control target
= control target key end

     0   :  { %vm31_vm0 = vcmask 130048   ;;  %v216_v3 = vmov 0.0|0.0   ;;  %s323_s0 = inlined_call_operand.vmem [shape: f32[8,32], index: 0, kind: input, shape index: {}]   ;;  %s324_s1 = inlined_call_operand.vmem [shape: f32[4,32,16], index: 1, kind: input, shape index: {}]   ;;  %s325_s2 = inlined_call_operand.vmem [shape: f32[4,16], index: 2, kind: input, shape index: {}]   ;;  %s326_s3 = inlined_call_operand.hbm [shape: f32[8,16], index: 3, kind: output, shape index: {}]  }
   0x1   :  { %v15_v0 = vld [vmem:[%s324_s1] sm:$0xff]  ;;  %v16_v1 = vld [vmem:[%s324_s1 + $0x8] sm:$0xff]  ;;  %182 = vmatprep.subr.bf16.mxu0 %v216_v3  ;;  %v17_v16 = vld [vmem:[%s324_s1 + $0x10] sm:$0xff] }
   0x2   :  { %v19_v2 = vld [vmem:[%s324_s1 + $0x20] sm:$0xff]  ;;  %v20_v4 = vld [vmem:[%s324_s1 + $0x28] sm:$0xff]  ;;  %v32_v7 = vsel %vm31_vm0, %v15_v0, 0.0  ;;  %v39_v9 = vsel %vm31_vm0, %v16_v1, 0.0  ;;  %v18_v20 = vld [vmem:[%s324_s1 + $0x18] sm:$0xff]  ;;  %v46_v23 = vsel %vm31_vm0, %v17_v16, 0.0 }
   0x3   :  { %v23_v5 = vld [vmem:[%s324_s1 + $0x40] sm:$0xff]  ;;  %v24_v6 = vld [vmem:[%s324_s1 + $0x48] sm:$0xff]  ;;  %v33_v8 = vsel %vm31_vm0, %v19_v2, 0.0  ;;  %v40_v14 = vsel %vm31_vm0, %v20_v4, 0.0  ;;  %v21_v21 = vld [vmem:[%s324_s1 + $0x30] sm:$0xff]  ;;  %v53_v29 = vsel %vm31_vm0, %v18_v20, 0.0 }
   0x4   :  { %v27_v10 = vld [vmem:[%s324_s1 + $0x60] sm:$0xff]  ;;  %v28_v11 = vld [vmem:[%s324_s1 + $0x68] sm:$0xff]  ;;  %v34_v12 = vadd.f32 %v33_v8, %v32_v7  ;;  %v35_v13 = vsel %vm31_vm0, %v23_v5, 0.0  ;;  %v42_v15 = vsel %vm31_vm0, %v24_v6, 0.0  ;;  %v41_v18 = vadd.f32 %v40_v14, %v39_v9  ;;  %v22_v22 = vld [vmem:[%s324_s1 + $0x38] sm:$0xff] }
   0x5   :  { %v37_v17 = vsel %vm31_vm0, %v27_v10, 0.0  ;;  %v44_v19 = vsel %vm31_vm0, %v28_v11, 0.0  ;;  %v25_v25 = vld [vmem:[%s324_s1 + $0x50] sm:$0xff]  ;;  %v26_v26 = vld [vmem:[%s324_s1 + $0x58] sm:$0xff]  ;;  %v47_v28 = vsel %vm31_vm0, %v21_v21, 0.0  ;;  %v54_v30 = vsel %vm31_vm0, %v22_v22, 0.0 }
   0x6   :  { %v36_v24 = vadd.f32 %v35_v13, %v34_v12  ;;  %v29_v27 = vld [vmem:[%s324_s1 + $0x70] sm:$0xff]  ;;  %v43_v31 = vadd.f32 %v42_v15, %v41_v18  ;;  %v30_v32 = vld [vmem:[%s324_s1 + $0x78] sm:$0xff]  ;;  %v48_v33 = vadd.f32 %v47_v28, %v46_v23  ;;  %v49_v34 = vsel %vm31_vm0, %v25_v25, 0.0 }
   0x7   :  { %v51_v36 = vsel %vm31_vm0, %v29_v27, 0.0  ;;  %v55_v37 = vadd.f32 %v54_v30, %v53_v29  ;;  %v56_v38 = vsel %vm31_vm0, %v26_v26, 0.0 }
   0x8   :  { %v38_v35 = vadd.f32 %v37_v17, %v36_v24 }
   0x9   :  { %8 = vsyncpa [#allocation3], 0  ;;  %v45_v39 = vadd.f32 %v44_v19, %v43_v31  ;;  %v50_v40 = vadd.f32 %v49_v34, %v48_v33  ;;  %v58_v41 = vsel %vm31_vm0, %v30_v32, 0.0  ;;  %v57_v43 = vadd.f32 %v56_v38, %v55_v37  ;;  %v75_v52 = vld [vmem:[%s323_s0] sm:$0xff]  ;;  %s219_s20 = smov [#allocation2]  }
   0xa   :  { %v61_v42 = vmul.f32 0.25, %v38_v35  ;;  %vm217_vm1 = vmmov 0   ;;  %v218_v44 = vmov 0.0   ;;  %vm76_vm2 = vcmask 261120   ;;  %v65_v53 = vld [vmem:[%s325_s2] sm:$0xf] }
   0xb   :  { %179 = vmatprep.mubr.msk.f32.mxu0 %vm217_vm1, %v218_v44  ;;  %v62_v45 = vmul.f32 0.25, %v45_v39  ;;  %v52_v46 = vadd.f32 %v51_v36, %v50_v40  ;;  %v59_v47 = vadd.f32 %v58_v41, %v57_v43  ;;  %vm66_vm3 = vcmask 125952   ;;  %s157_s21 = sshll.u32 %s219_s20, 4  ;;  %s158_s21 = int_to_ptr.vmem [resolvable:$true] %s157_s21 }
   0xc   :  { %v67_v54 = vsel %vm66_vm3, %v65_v53, 0.0  ;;  %s192_s0 = scalar_lea.vmem %s158_s21, 128  ;;  %p197_p1 = scmp.lt.s32.totalorder %s158_s21, %s158_s21 }
   0xd   :  { %v183_v48 = vpack.c.bf16 %v62_v45, %v61_v42  ;;  %v63_v49 = vmul.f32 0.25, %v52_v46  ;;  %v64_v50 = vmul.f32 0.25, %v59_v47  ;;  %v68_v55 = vrot.slane %v67_v54, 4  ;;  %p193_p0 = scmp.ne.s32.totalorder %s158_s21, %s192_s0  ;;  %p198_p2 = scmp.lt.s32.totalorder %s192_s0, %s192_s0 }
   0xf   :  { %184 = vmatpush3.bf16.msra.mxu0 %v183_v48  ;;  %v186_v51 = vpack.c.bf16 %v64_v50, %v63_v49  ;;  %v69_v56 = vadd.f32 %v68_v55, %v67_v54  ;;  %p199_p3 = por %p198_p2, %p197_p1 }
  0x10   :  { %185 = vmatprep.subr.bf16.mxu0 %v216_v3 }
  0x11   :  { %v70_v57 = vrot.slane %v69_v56, 2  ;;  %p200_p4 = pnand %p199_p3, %p193_p0 }
  0x13   :  { %187 = vmatpush3.bf16.msra.mxu0 %v186_v51  ;;  %v71_v58 = vadd.f32 %v70_v57, %v69_v56 }
  0x15   :  { %v72_v59 = vrot.slane %v71_v58, 1 }
  0x16   :  { %180 = vmatmul.mubr.msk.f32.vlgmr.msra.gmra.mrb[0].mxu0 %vm76_vm2, %v75_v52 }
  0x17   :  { %v73_v60 = vadd.f32 %v72_v59, %v71_v58 }
  0x19   :  { %v74_v61 = vmul.f32 0.25, %v73_v60 }
  0xe9   :  { %v146_v62 = vpop.f32.mrb[0].mxu0 }
  0xea   :  { %v147_v63 = vadd.f32 %v146_v62, %v74_v61  ;;  %v181_v0 = vpop.f32.mrb[1].mxu0 }
  0xec   :  { %150 = vst.msk [vmem:[#allocation2] sm:$0xff] %vm31_vm0, %v147_v63 }
  0xed   :  { %203 = shalt.err (!%p200_p4)
}
  0xee   :  { %s204_s23 = scalar_lea.hbm %s326_s3, 128 }
  0xef   :  { %p205_p5 = scmp.ne.s32.totalorder %s326_s3, %s204_s23  ;;  %p208_p6 = scmp.lt.u32.totalorder %s204_s23, %s326_s3 }
  0xf1   :  { %p210_p7 = pnand %p208_p6, %p205_p5 }
  0xf3   :  { %213 = shalt.err (!%p210_p7)
}
  0xf4   :  { %160 = dma.vmem_to_hbm [thread:$0]  %s158_s21, 128, %s326_s3, [#allocation3]  }
  0xf5   :  { %214 = dma.done.wait [#allocation3], 128  }
  0xf6   :  { %215 = vsyncadd [#allocation3], 4294967168 }
  0xf7   :  { %164 = vsyncpa [#allocation3], 1 }

</bundles_post_ra>
